<compile_context>
chip_gen: v6e
topology: v6e:2x2x1
jax: 0.10.0
libtpu: 0.0.40
codegen_flags: <defaults>
</compile_context>

<pallas_src>
import functools

import jax
import jax.numpy as jnp
from jax.experimental import pallas as pl
from jax.experimental.pallas import tpu as pltpu


# ----------------------------------------------------------------------------
# Layout constants.  Kernel is specialized to the 3-Linear MLP [8, 32, 32, 4].
# ----------------------------------------------------------------------------
LANE = 128           # TPU lane width; all weights are lane-padded to 128 cols
D_IN = 8             # layers[0]
HID = 32             # layers[1] == layers[2]

# bf16 weight slab: every region start/extent is 16-row aligned so slices sit
# on bf16 (16,128) sublane-tile boundaries.
W1_ROW, W1_ROWS = 0, D_IN      # rows [0, 8)   used (region padded to 16 rows)
W2_ROW, W2_ROWS = 16, HID      # rows [16, 48)
W3_ROW, W3_ROWS = 48, HID      # rows [48, 80)
WSLAB_ROWS = 80                # 80 x 128 x 2 B = 20 KiB (was 204 KiB f32)

BIAS_ROWS = 8                  # one (8,128) f32 tile; rows 0/1/2 = b1/b2/b3


# ----------------------------------------------------------------------------
# Pallas kernel: fused Agent MLP forward on one VMEM tile set.
# ----------------------------------------------------------------------------
def _agent_mlp_kernel(slopes_ref,   # SMEM (2,)            f32: PReLU slopes
                      x_ref,        # VMEM (B, D_IN)       f32: state
                      w_ref,        # VMEM (WSLAB_ROWS,128) bf16: packed weights
                      b_ref,        # VMEM (8, 128)        f32: packed biases
                      q_ref):       # VMEM (B, 128)        f32: lane-dense output
    x = x_ref[...].astype(jnp.bfloat16)                        # (B, 8)

    # Layer 1: (B,8) x (8,128) -> (B,128); only lanes [0,HID) are meaningful.
    w1 = w_ref[W1_ROW:W1_ROW + W1_ROWS, :]
    h = jnp.dot(x, w1, preferred_element_type=jnp.float32)
    h = h + b_ref[0:1, :]
    a1 = slopes_ref[0]
    h = jnp.where(h > 0.0, h, a1 * h)                          # PReLU (f32 VPU)

    # Layer 2: K=32 via h[:, :HID] (stays inside one lane tile).
    w2 = w_ref[W2_ROW:W2_ROW + W2_ROWS, :]
    h = jnp.dot(h[:, :HID].astype(jnp.bfloat16), w2,
                preferred_element_type=jnp.float32)
    h = h + b_ref[1:2, :]
    a2 = slopes_ref[1]
    h = jnp.where(h > 0.0, h, a2 * h)                          # PReLU

    # Layer 3: K=32, lane-dense (B,128) store; caller slices to d_out.
    w3 = w_ref[W3_ROW:W3_ROW + W3_ROWS, :]
    q = jnp.dot(h[:, :HID].astype(jnp.bfloat16), w3,
                preferred_element_type=jnp.float32)
    q_ref[...] = q + b_ref[2:3, :]


@functools.partial(jax.jit, static_argnames=("d_out",))
def agent_forward(state, slopes, w_slab, biases, *, d_out):
    """Agent.forward: state [B, D_IN] f32 -> Q-values [B, d_out] f32."""
    B, d_in = state.shape
    assert d_in == D_IN, "kernel slab layout assumes layers[0] == 8"

    vmem = pl.BlockSpec(memory_space=pltpu.MemorySpace.VMEM)
    smem = pl.BlockSpec(memory_space=pltpu.MemorySpace.SMEM)

    q = pl.pallas_call(
        _agent_mlp_kernel,
        out_shape=jax.ShapeDtypeStruct((B, LANE), jnp.float32),
        in_specs=[smem, vmem, vmem, vmem],
        out_specs=vmem,
    )(slopes, state.astype(jnp.float32), w_slab, biases)
    return q[:, :d_out]


# ----------------------------------------------------------------------------
# RandomAgent.forward: uniform random action in [0, n_actions).
# Per perf review this is NOT a Pallas kernel: a dedicated pallas_call launch
# (+ SMEM in/out DMA) costs microseconds for a nanosecond scalar op.
# ----------------------------------------------------------------------------
@functools.partial(jax.jit, static_argnames=("n_actions",))
def random_agent_forward(key, *, n_actions):
    """RandomAgent.forward: ignores the state, returns a random int32 action."""
    return jax.random.randint(key, (), 0, n_actions, dtype=jnp.int32)


# ----------------------------------------------------------------------------
# Deterministic parameter construction (PyTorch-default-style init, seeded).
# ----------------------------------------------------------------------------
def make_params(layers, key):
    """layers = [D0, H1, H2, Dout]. Returns ((w1,b1,a1),(w2,b2,a2),(w3,b3))."""
    assert len(layers) == 4, "kernel is specialized to 3 Linear layers"
    assert all(d <= LANE for d in layers), "layer widths must be <= 128"
    assert layers[0] == D_IN and layers[1] == HID and layers[2] == HID
    params = []
    n = len(layers)
    for i in range(n - 1):
        fan_in, fan_out = layers[i], layers[i + 1]
        key, kw, kb = jax.random.split(key, 3)
        bound = 1.0 / (fan_in ** 0.5)
        # stored as [in, out] (transposed vs. PyTorch's [out, in])
        w = jax.random.uniform(kw, (fan_in, fan_out), jnp.float32, -bound, bound)
        b = jax.random.uniform(kb, (1, fan_out), jnp.float32, -bound, bound)
        if i < n - 2:
            a = jnp.array([0.25], dtype=jnp.float32)   # nn.PReLU default slope
            params.append((w, b, a))
        else:
            params.append((w, b))
    return tuple(params)


def pack_params(params):
    """Pack weights into one bf16 lane-padded slab, biases into one f32 tile.

    Invariant: all padding rows/lanes are zero; the kernel relies on zero-padded
    W* lanes so that unused output lanes stay exactly zero.
    """
    (w1, b1, a1), (w2, b2, a2), (w3, b3) = params

    w_slab = jnp.zeros((WSLAB_ROWS, LANE), jnp.bfloat16)
    w_slab = w_slab.at[W1_ROW:W1_ROW + w1.shape[0], :w1.shape[1]].set(
        w1.astype(jnp.bfloat16))
    w_slab = w_slab.at[W2_ROW:W2_ROW + w2.shape[0], :w2.shape[1]].set(
        w2.astype(jnp.bfloat16))
    w_slab = w_slab.at[W3_ROW:W3_ROW + w3.shape[0], :w3.shape[1]].set(
        w3.astype(jnp.bfloat16))

    biases = jnp.zeros((BIAS_ROWS, LANE), jnp.float32)
    biases = biases.at[0, :b1.shape[1]].set(b1[0])
    biases = biases.at[1, :b2.shape[1]].set(b2[0])
    biases = biases.at[2, :b3.shape[1]].set(b3[0])

    slopes = jnp.concatenate([a1, a2]).astype(jnp.float32)     # (2,)
    return slopes, w_slab, biases


# ----------------------------------------------------------------------------
# Reference (pure JAX) mirroring the kernel's bf16-weight / f32-accumulate math.
# ----------------------------------------------------------------------------
def agent_forward_ref(state, params):
    (w1, b1, a1), (w2, b2, a2), (w3, b3) = params
    hi = jax.lax.Precision.HIGHEST

    def bdot(a, w):
        a16 = a.astype(jnp.bfloat16).astype(jnp.float32)
        w16 = w.astype(jnp.bfloat16).astype(jnp.float32)
        return jnp.dot(a16, w16, precision=hi)

    h = bdot(state, w1) + b1
    h = jnp.where(h > 0, h, a1[0] * h)
    h = bdot(h, w2) + b2
    h = jnp.where(h > 0, h, a2[0] * h)
    return bdot(h, w3) + b3


if __name__ == "__main__":
    key = jax.random.PRNGKey(0)

    # Agent MLP layers [8, 32, 32, 4]; batch is a multiple of 8 sublanes.
    layers = [8, 32, 32, 4]
    n_actions = layers[-1]
    batch = 8

    key, k_state, k_params, k_act = jax.random.split(key, 4)
    state = jax.random.normal(k_state, (batch, layers[0]), dtype=jnp.float32)
    params = make_params(layers, k_params)
    slopes, w_slab, biases = pack_params(params)

    # --- Agent (parent class) MLP forward through the fused Pallas kernel ---
    q_vals = agent_forward(state, slopes, w_slab, biases, d_out=n_actions)
    q_vals = jax.block_until_ready(q_vals)
    q_ref = agent_forward_ref(state, params)
    assert q_vals.shape == (batch, n_actions)
    assert jnp.allclose(q_vals, q_ref, atol=1e-3, rtol=1e-3), "MLP kernel mismatch"

    # --- RandomAgent forward: uniform random action in [0, n_actions) ---
    action = random_agent_forward(k_act, n_actions=n_actions)
    action = jax.block_until_ready(action)
    assert action.dtype == jnp.int32
    assert 0 <= int(action) < n_actions

    print("KERNEL_OK")
</pallas_src>

<mosaic_0001>
module attributes {stable_mosaic.version = 11 : i64} {
  func.func @_agent_mlp_kernel(%arg0: memref<2xf32, #tpu.memory_space<smem>>, %arg1: memref<8x8xf32, #tpu.memory_space<vmem>>, %arg2: memref<80x128xbf16, #tpu.memory_space<vmem>>, %arg3: memref<8x128xf32, #tpu.memory_space<vmem>>, %arg4: memref<8x128xf32, #tpu.memory_space<vmem>>) attributes {dimension_semantics = [], scalar_prefetch = 0 : i64, scratch_operands = 0 : i64, tpu.core_type = #tpu.core_type<tc>} {
    %c0 = arith.constant 0 : index
    %c0_0 = arith.constant 0 : index
    %0 = vector.load %arg1[%c0, %c0_0] : memref<8x8xf32, #tpu.memory_space<vmem>>, vector<8x8xf32>
    %1 = arith.truncf %0 : vector<8x8xf32> to vector<8x8xbf16>
    %c0_1 = arith.constant 0 : index
    %c0_2 = arith.constant 0 : index
    %2 = vector.load %arg2[%c0_1, %c0_2] : memref<80x128xbf16, #tpu.memory_space<vmem>>, vector<8x128xbf16>
    %cst = arith.constant dense<0.000000e+00> : vector<8x128xf32>
    %3 = tpu.matmul %1, %2, %cst {dimension_numbers = #tpu.dot_dimension_numbers<[1], [0], [0], [1], [0, 0, 1, 1], [], []>} : vector<8x8xbf16>, vector<8x128xbf16>, vector<8x128xf32> -> vector<8x128xf32>
    %c0_3 = arith.constant 0 : index
    %c0_4 = arith.constant 0 : index
    %4 = vector.load %arg3[%c0_3, %c0_4] : memref<8x128xf32, #tpu.memory_space<vmem>>, vector<1x128xf32>
    %5 = vector.broadcast %4 : vector<1x128xf32> to vector<8x128xf32>
    %6 = arith.addf %3, %5 : vector<8x128xf32>
    %c0_5 = arith.constant 0 : index
    %7 = memref.load %arg0[%c0_5] : memref<2xf32, #tpu.memory_space<smem>>
    %cst_6 = arith.constant 0.000000e+00 : f32
    %8 = vector.broadcast %cst_6 : f32 to vector<8x128xf32>
    %9 = arith.cmpf ogt, %6, %8 : vector<8x128xf32>
    %10 = vector.broadcast %7 : f32 to vector<8x128xf32>
    %11 = arith.mulf %10, %6 : vector<8x128xf32>
    %12 = arith.select %9, %6, %11 : vector<8x128xi1>, vector<8x128xf32>
    %c16 = arith.constant 16 : index
    %c0_7 = arith.constant 0 : index
    %13 = vector.load %arg2[%c16, %c0_7] : memref<80x128xbf16, #tpu.memory_space<vmem>>, vector<32x128xbf16>
    %14 = vector.extract_strided_slice %12 {offsets = [0, 0], sizes = [8, 32], strides = [1, 1]} : vector<8x128xf32> to vector<8x32xf32>
    %15 = arith.truncf %14 : vector<8x32xf32> to vector<8x32xbf16>
    %cst_8 = arith.constant dense<0.000000e+00> : vector<8x128xf32>
    %16 = tpu.matmul %15, %13, %cst_8 {dimension_numbers = #tpu.dot_dimension_numbers<[1], [0], [0], [1], [0, 0, 1, 1], [], []>} : vector<8x32xbf16>, vector<32x128xbf16>, vector<8x128xf32> -> vector<8x128xf32>
    %c1 = arith.constant 1 : index
    %c0_9 = arith.constant 0 : index
    %17 = vector.load %arg3[%c1, %c0_9] : memref<8x128xf32, #tpu.memory_space<vmem>>, vector<1x128xf32>
    %18 = vector.broadcast %17 : vector<1x128xf32> to vector<8x128xf32>
    %19 = arith.addf %16, %18 : vector<8x128xf32>
    %c1_10 = arith.constant 1 : index
    %20 = memref.load %arg0[%c1_10] : memref<2xf32, #tpu.memory_space<smem>>
    %cst_11 = arith.constant 0.000000e+00 : f32
    %21 = vector.broadcast %cst_11 : f32 to vector<8x128xf32>
    %22 = arith.cmpf ogt, %19, %21 : vector<8x128xf32>
    %23 = vector.broadcast %20 : f32 to vector<8x128xf32>
    %24 = arith.mulf %23, %19 : vector<8x128xf32>
    %25 = arith.select %22, %19, %24 : vector<8x128xi1>, vector<8x128xf32>
    %c48 = arith.constant 48 : index
    %c0_12 = arith.constant 0 : index
    %26 = vector.load %arg2[%c48, %c0_12] : memref<80x128xbf16, #tpu.memory_space<vmem>>, vector<32x128xbf16>
    %27 = vector.extract_strided_slice %25 {offsets = [0, 0], sizes = [8, 32], strides = [1, 1]} : vector<8x128xf32> to vector<8x32xf32>
    %28 = arith.truncf %27 : vector<8x32xf32> to vector<8x32xbf16>
    %cst_13 = arith.constant dense<0.000000e+00> : vector<8x128xf32>
    %29 = tpu.matmul %28, %26, %cst_13 {dimension_numbers = #tpu.dot_dimension_numbers<[1], [0], [0], [1], [0, 0, 1, 1], [], []>} : vector<8x32xbf16>, vector<32x128xbf16>, vector<8x128xf32> -> vector<8x128xf32>
    %c2 = arith.constant 2 : index
    %c0_14 = arith.constant 0 : index
    %30 = vector.load %arg3[%c2, %c0_14] : memref<8x128xf32, #tpu.memory_space<vmem>>, vector<1x128xf32>
    %31 = vector.broadcast %30 : vector<1x128xf32> to vector<8x128xf32>
    %32 = arith.addf %29, %31 : vector<8x128xf32>
    %c0_15 = arith.constant 0 : index
    %c0_16 = arith.constant 0 : index
    %33 = vector.load %arg4[%c0_15, %c0_16] : memref<8x128xf32, #tpu.memory_space<vmem>>, vector<8x128xf32>
    tpu.vector_store %arg4[%c0_15, %c0_16], %32 {strides = array<i32>} : memref<8x128xf32, #tpu.memory_space<vmem>>, vector<8x128xf32>,
    return
  }
}

</mosaic_0001>

<bundles_post_ra>
// kernel: agent_forward.1
= control target key start
LH: loop header
LB: loop body
LE: loop exit
PB: predicated region body
PF: predicated region fallthrough
CT: control target
= control target key end

     0   :  { %9 = vsyncpa [#allocation4], 0  ;;  %s454_s0 = inlined_call_operand.vmem [shape: f32[2], index: 0, kind: input, shape index: {}]   ;;  %s455_s1 = inlined_call_operand.hbm [shape: f32[8,8], index: 1, kind: input, shape index: {}]   ;;  %s456_s2 = inlined_call_operand.hbm [shape: bf16[80,128], index: 2, kind: input, shape index: {}]   ;;  %s457_s3 = inlined_call_operand.hbm [shape: f32[8,128], index: 3, kind: input, shape index: {}]   ;;  %s458_s4 = inlined_call_operand.vmem [shape: f32[8,128], index: 4, kind: output, shape index: {}]  }
   0x1   :  { %10 = vsyncpa [#allocation3], 0 }
   0x2   :  { %11 = vsyncpa [#allocation7], 0  ;;  %s404_s15 = smov [#allocation6]   ;;  %s18_s19 = sshll.u32 %s454_s0, 4  ;;  %s19_s19 = int_to_ptr.vmem [resolvable:$true] %s18_s19 }
   0x3   :  { %s37_s16 = sshll.u32 %s404_s15, 4  ;;  %s38_s16 = int_to_ptr.vmem [resolvable:$true] %s37_s16 }
   0x4   :  { %s334_s20 = scalar_lea.vmem %s38_s16, 640  ;;  %p339_p1 = scmp.lt.s32.totalorder %s38_s16, %s38_s16 }
   0x5   :  { %p335_p0 = scmp.ne.s32.totalorder %s38_s16, %s334_s20  ;;  %p340_p2 = scmp.lt.s32.totalorder %s334_s20, %s334_s20 }
   0x7   :  { %p341_p3 = por %p340_p2, %p339_p1 }
   0x9   :  { %p342_p4 = pnand %p341_p3, %p335_p0 }
   0xb   :  { %345 = shalt.err (!%p342_p4)
}
   0xc   :  { %s405_s21 = smov 64   ;;  %s406_s22 = smov 4  }
   0xd   :  { %43 = dma.hbm_to_vmem [thread:$0]  %s456_s2, 640, %s38_s16, [#allocation7], %s405_s21, %s405_s21, %s406_s22  }
   0xe   :  { %s346_s25 = scalar_lea.vmem %s19_s19, 16  ;;  %p351_p6 = scmp.lt.s32.totalorder %s19_s19, %s19_s19 }
   0xf   :  { %p347_p5 = scmp.ne.s32.totalorder %s19_s19, %s346_s25  ;;  %p352_p7 = scmp.lt.s32.totalorder %s346_s25, %s346_s25 }
  0x11   :  { %p353_p8 = por %p352_p7, %p351_p6 }
  0x13   :  { %p354_p9 = pnand %p353_p8, %p347_p5 }
  0x15   :  { %357 = shalt.err (!%p354_p9)
}
  0x16   :  { %s407_s0 = smov [#allocation2]   ;;  %s408_s26 = smov [#allocation5]  }
  0x17   :  { %21 = dma.vmem_to_smem %s19_s19, 16, %s407_s0, [#allocation4]  }
  0x18   :  { %s28_s27 = sshll.u32 %s408_s26, 4  ;;  %s409_s28 = smov [#allocation8]   ;;  %s29_s27 = int_to_ptr.vmem [resolvable:$true] %s28_s27 }
  0x19   :  { %s50_s29 = sshll.u32 %s409_s28, 4  ;;  %s366_s30 = scalar_lea.vmem %s29_s27, 128  ;;  %s51_s29 = int_to_ptr.vmem [resolvable:$true] %s50_s29 }
  0x1a   :  { %p367_p10 = scmp.ne.s32.totalorder %s29_s27, %s366_s30  ;;  %p371_p11 = scmp.lt.s32.totalorder %s29_s27, %s29_s27 }
  0x1b   :  { %p372_p12 = scmp.lt.s32.totalorder %s366_s30, %s366_s30 }
  0x1d   :  { %p373_p13 = por %p372_p12, %p371_p11 }
  0x1f   :  { %p374_p0 = pnand %p373_p13, %p367_p10 }
  0x21   :  { %377 = shalt.err (!%p374_p0)
}
  0x22   :  { %31 = dma.hbm_to_vmem [thread:$0]  %s455_s1, 128, %s29_s27, [#allocation3]  }
  0x23   :  { %s386_s6 = scalar_lea.vmem %s51_s29, 128  ;;  %p391_p2 = scmp.lt.s32.totalorder %s51_s29, %s51_s29 }
  0x24   :  { %p387_p1 = scmp.ne.s32.totalorder %s51_s29, %s386_s6  ;;  %p392_p3 = scmp.lt.s32.totalorder %s386_s6, %s386_s6 }
  0x26   :  { %p393_p4 = por %p392_p3, %p391_p2 }
  0x28   :  { %p394_p5 = pnand %p393_p4, %p387_p1 }
  0x2a   :  { %397 = shalt.err (!%p394_p5)
}
  0x2b   :  { %53 = dma.hbm_to_vmem [thread:$0]  %s457_s3, 128, %s51_s29, [#allocation7]  }
  0x2c   :  { %398 = dma.done.wait [#allocation4], 16  }
  0x2d   :  { %399 = vsyncadd [#allocation4], 4294967280 }
  0x2e   :  { %400 = dma.done.wait [#allocation3], 128  }
  0x2f   :  { %401 = vsyncadd [#allocation3], 4294967168 }
  0x30   :  { %402 = dma.done.wait [#allocation7], 768  }
  0x31   :  { %403 = vsyncadd [#allocation7], 4294966528 }
  0x32   :  { %66 = sfence }
  0x33   :  { %v70_v0 = vld [vmem:[#allocation6] sm:$0xf]  ;;  %vm80_vm0 = vcmask 1043456   ;;  %v68_v1 = vld [vmem:[#allocation5] sm:$0xff]  ;;  %v410_v2 = vmov 0.0   ;;  %vm411_vm1 = vmmov 0  }
  0x34   :  { %292 = vmatprep.subr.bf16.mxu0 %v410_v2  ;;  %v82_v3 = vsel %vm80_vm0, %v70_v0, 0  ;;  %294 = vmatprep.mubr.msk.bf16.mxu0 %vm411_vm1, %v410_v2  ;;  %v69_v4 = vpack.c.bf16 %v68_v1, %v68_v1  ;;  %vm76_vm2 = vcmask 64512   ;;  %v322_v5 = vld [vmem:[#allocation6 + $0x10] sm:$0xff]   ;;  %v323_v6 = vld [vmem:[#allocation6 + $0x8] sm:$0xff]   ;;  %s124_s1 = sld [smem:[#allocation2]]  ;;  %vm151_vm4 = vcmask 261120  }
  0x35   :  { %293 = vmatpush3.bf16.msra.mxu0 %v82_v3  ;;  %298 = vmatprep.subr.bf16.mxu1 %v410_v2  ;;  %v273_v7 = vld [vmem:[#allocation8] ss:$0 sm:$0xff]  ;;  %v324_v17 = vld [vmem:[#allocation6 + $0x20] sm:$0xff]   ;;  %v325_v18 = vld [vmem:[#allocation6 + $0x18] sm:$0xff]   ;;  %s279_s3 = sld [smem:[#allocation2 + $0x1]] }
  0x36   :  { %302 = vmatprep.mubr.msk.bf16.mxu1 %vm411_vm1, %v410_v2  ;;  %306 = vmatprep.subr.bf16.mxu0 %v410_v2  ;;  %v275_v19 = vld [vmem:[#allocation8 + $0x1] ss:$0 sm:$0xff]  ;;  %v280_v29 = vld [vmem:[#allocation8 + $0x2] ss:$0 sm:$0xff] }
  0x37   :  { %299 = vmatpush3.bf16.msra.mxu1 %v322_v5 }
  0x38   :  { %295 = vmatmul.mubr.msk.bf16.vlgmr.msra.gmra.mxu0 %vm76_vm2, %v69_v4  ;;  %300 = vmatprep.subr.bf16.mxu1 %v410_v2 }
  0x39   :  { %310 = vmatprep.mubr.msk.bf16.mxu0 %vm411_vm1, %v410_v2  ;;  %307 = vmatpush3.bf16.msra.mxu0 %v324_v17 }
  0x3a   :  { %v126_v9 = vstv %s124_s1  ;;  %308 = vmatprep.subr.bf16.mxu0 %v410_v2 }
  0x3b   :  { %301 = vmatpush3.bf16.msra.mxu1 %v323_v6  ;;  %v197_v21 = vstv %s279_s3 }
  0x3d   :  { %309 = vmatpush3.bf16.msra.mxu0 %v325_v18 }
  0xf8   :  { %v118_v8 = vpop.f32.mrf.mxu0 }
  0xf9   :  { %v119_v10 = vadd.f32 %v273_v7, %v118_v8 }
  0xfa   :  { %v296_v11 = vpop.f32.mrf.mxu0 }
  0xfb   :  { %vm125_vm3 = vcmp.gt.f32.partialorder %v119_v10, 0.0  ;;  %v127_v12 = vmul.f32 %v126_v9, %v119_v10 }
  0xfc   :  { %v121_v13 = vpop.f32.mrf.mxu0 }
  0xfd   :  { %v128_v14 = vsel %vm125_vm3, %v119_v10, %v127_v12 }
  0xfe   :  { %v133_v15 = vpack.c.bf16 %v128_v14, %v128_v14  ;;  %v297_v16 = vpop.f32.mrf.mxu0 }
 0x100   :  { %303 = vmatmul.mubr.msk.bf16.vlgmr.msra.gmra.mxu1 %vm151_vm4, %v133_v15 }
 0x1c0   :  { %v189_v20 = vpop.f32.mrf.mxu1 }
 0x1c1   :  { %v190_v22 = vadd.f32 %v275_v19, %v189_v20 }
 0x1c2   :  { %v304_v23 = vpop.f32.mrf.mxu1 }
 0x1c3   :  { %vm196_vm5 = vcmp.gt.f32.partialorder %v190_v22, 0.0  ;;  %v198_v24 = vmul.f32 %v197_v21, %v190_v22 }
 0x1c4   :  { %v192_v25 = vpop.f32.mrf.mxu1 }
 0x1c5   :  { %v199_v26 = vsel %vm196_vm5, %v190_v22, %v198_v24 }
 0x1c6   :  { %v204_v27 = vpack.c.bf16 %v199_v26, %v199_v26  ;;  %v305_v28 = vpop.f32.mrf.mxu1 }
 0x1c8   :  { %311 = vmatmul.mubr.msk.bf16.vlgmr.msra.gmra.mxu0 %vm151_vm4, %v204_v27 }
 0x288   :  { %v259_v30 = vpop.f32.mrf.mxu0 }
 0x289   :  { %v260_v31 = vadd.f32 %v280_v29, %v259_v30 }
 0x28a   :  { %v312_v32 = vpop.f32.mrf.mxu0 }
 0x28b   :  { %265 = vst [vmem:[%s458_s4] sm:$0xff] %v260_v31 }
 0x28c   :  { %v262_v33 = vpop.f32.mrf.mxu0 }
 0x28e   :  { %v313_v34 = vpop.f32.mrf.mxu0 }
 0x28f   :  { %270 = vsyncpa [#allocation3], 1 }
 0x290   :  { %271 = vsyncpa [#allocation7], 1 }
 0x291   :  { %272 = vsyncpa [#allocation4], 1 }

</bundles_post_ra>
